<compile_context>
chip_gen: v5e
topology: v5e:2x2
jax: 0.10.0
libtpu: 0.0.40
codegen_flags: <defaults>
</compile_context>

<pallas_src>
import jax
import jax.numpy as jnp
from jax.experimental import pallas as pl
from jax.experimental.pallas import tpu as pltpu

IN_SIZE = 13
H1, H2 = 64, 32
OUT_SIZE = 3
OUT_PAD = 128          # lane-dense output slab width
DEFAULT_TB = 2048      # batch tile (rows); safe on v5e / v6e / v7x


def _round_up(n, m):
    return ((n + m - 1) // m) * m


def mlp_kernel(x_ref, w1_ref, b1_ref, w2_ref, b2_ref, w3_ref, b3_ref, o_ref):
    x = x_ref[...]                                                 # (TB, 13) bf16

    # Layer 1: Linear(13 -> 64) + ReLU  (MXU bf16, f32 accumulate)
    h1 = jnp.dot(x, w1_ref[...], preferred_element_type=jnp.float32)
    h1 = jnp.maximum(h1 + b1_ref[...], 0.0)                        # f32 (TB, 64)

    # Layer 2: Linear(64 -> 32) + ReLU
    h2 = jnp.dot(h1.astype(jnp.bfloat16), w2_ref[...],
                 preferred_element_type=jnp.float32)
    h2 = jnp.maximum(h2 + b2_ref[...], 0.0)                        # f32 (TB, 32)

    # Layer 3: Linear(32 -> 128-padded-3), no activation
    y = jnp.dot(h2.astype(jnp.bfloat16), w3_ref[...],
                preferred_element_type=jnp.float32)
    o_ref[...] = (y + b3_ref[...]).astype(o_ref.dtype)             # (TB, 128)


def mlp_forward(x, params, *, block_rows=DEFAULT_TB):
    """x: (B, 13) f32. params: dict w1,b1,w2,b2,w3,b3 (weights as (in, out))."""
    B, in_size = x.shape
    assert in_size == params["w1"].shape[0]

    # Batch tile: multiple of 16 (bf16 sublane packing), no larger than needed.
    tb = min(block_rows, _round_up(B, 16))
    tb = _round_up(tb, 16)
    b_pad = _round_up(B, tb)

    # Cast the HBM-dominant streams to bf16; biases stay f32.
    x_bf = x.astype(jnp.bfloat16)
    if b_pad != B:
        x_bf = jnp.pad(x_bf, ((0, b_pad - B), (0, 0)))
    w1 = params["w1"].astype(jnp.bfloat16)
    w2 = params["w2"].astype(jnp.bfloat16)
    b1 = params["b1"].astype(jnp.float32)
    b2 = params["b2"].astype(jnp.float32)
    # Zero-pad layer 3 to a lane-dense 128-wide output.
    w3 = jnp.zeros((params["w3"].shape[0], OUT_PAD), jnp.bfloat16)
    w3 = w3.at[:, :OUT_SIZE].set(params["w3"].astype(jnp.bfloat16))
    b3 = jnp.zeros((1, OUT_PAD), jnp.float32)
    b3 = b3.at[:, :OUT_SIZE].set(params["b3"].astype(jnp.float32))

    grid = (b_pad // tb,)

    flops = 2 * b_pad * (in_size * H1 + H1 * H2 + H2 * OUT_SIZE)
    bytes_accessed = (
        b_pad * in_size * 2                        # x (bf16)
        + (w1.size + w2.size + w3.size) * 2        # weights (bf16)
        + (b1.size + b2.size + b3.size) * 4        # biases (f32)
        + b_pad * OUT_PAD * 4                      # output slab (f32)
    )

    const2 = lambda i: (0, 0)                      # resident weights / biases

    out_pad = pl.pallas_call(
        mlp_kernel,
        out_shape=jax.ShapeDtypeStruct((b_pad, OUT_PAD), jnp.float32),
        grid=grid,
        in_specs=[
            pl.BlockSpec((tb, in_size), lambda i: (i, 0)),
            pl.BlockSpec(w1.shape, const2),
            pl.BlockSpec(b1.shape, const2),
            pl.BlockSpec(w2.shape, const2),
            pl.BlockSpec(b2.shape, const2),
            pl.BlockSpec(w3.shape, const2),
            pl.BlockSpec(b3.shape, const2),
        ],
        out_specs=pl.BlockSpec((tb, OUT_PAD), lambda i: (i, 0)),
        compiler_params=pltpu.CompilerParams(
            dimension_semantics=("parallel",),
            vmem_limit_bytes=32 * 1024 * 1024,
        ),
        cost_estimate=pl.CostEstimate(
            flops=flops, transcendentals=0, bytes_accessed=bytes_accessed),
    )(x_bf, w1, b1, w2, b2, w3, b3)

    return out_pad[:B, :OUT_SIZE]


def init_params(key, input_size=IN_SIZE, hidden_layers=(H1, H2),
                output_size=OUT_SIZE):
    """Deterministic init mirroring nn.Linear default uniform(-1/sqrt(fan_in), ...)."""
    sizes = [input_size, *hidden_layers, output_size]
    params = {}
    for i, (fan_in, fan_out) in enumerate(zip(sizes[:-1], sizes[1:]), start=1):
        key, kw, kb = jax.random.split(key, 3)
        bound = 1.0 / jnp.sqrt(jnp.float32(fan_in))
        params[f"w{i}"] = jax.random.uniform(
            kw, (fan_in, fan_out), jnp.float32, -bound, bound)
        params[f"b{i}"] = jax.random.uniform(
            kb, (1, fan_out), jnp.float32, -bound, bound)
    return params


def mlp_reference_f32(x, params):
    h = jnp.maximum(x @ params["w1"] + params["b1"], 0.0)
    h = jnp.maximum(h @ params["w2"] + params["b2"], 0.0)
    return h @ params["w3"] + params["b3"]


def mlp_reference_bf16(x, params):
    """Precision-matched reference (bf16 operands, f32 accumulate)."""
    xb = x.astype(jnp.bfloat16)
    w1 = params["w1"].astype(jnp.bfloat16)
    w2 = params["w2"].astype(jnp.bfloat16)
    w3 = params["w3"].astype(jnp.bfloat16)
    h1 = jnp.maximum(
        jnp.dot(xb, w1, preferred_element_type=jnp.float32) + params["b1"], 0.0)
    h2 = jnp.maximum(
        jnp.dot(h1.astype(jnp.bfloat16), w2,
                preferred_element_type=jnp.float32) + params["b2"], 0.0)
    return (jnp.dot(h2.astype(jnp.bfloat16), w3,
                    preferred_element_type=jnp.float32) + params["b3"])


if __name__ == "__main__":
    key = jax.random.PRNGKey(0)
    kx, kp, kx2 = jax.random.split(key, 3)

    batch = 8
    x = jax.random.normal(kx, (batch, IN_SIZE), dtype=jnp.float32)
    params = init_params(kp)

    out = mlp_forward(x, params)
    out = jax.block_until_ready(out)
    assert out.shape == (batch, OUT_SIZE)

    ref_bf16 = mlp_reference_bf16(x, params)
    ref_f32 = mlp_reference_f32(x, params)
    assert jnp.allclose(out, ref_bf16, atol=1e-4, rtol=1e-4), \
        "mismatch vs precision-matched reference"
    assert jnp.allclose(out, ref_f32, atol=5e-2, rtol=5e-2), \
        "mismatch vs f32 reference"

    # Exercise the multi-tile grid + batch-padding path at small scale.
    batch2 = 40
    x2 = jax.random.normal(kx2, (batch2, IN_SIZE), dtype=jnp.float32)
    out2 = jax.block_until_ready(mlp_forward(x2, params, block_rows=16))
    assert out2.shape == (batch2, OUT_SIZE)
    assert jnp.allclose(out2, mlp_reference_bf16(x2, params),
                        atol=1e-4, rtol=1e-4), "mismatch on multi-tile grid"

    print("KERNEL_OK")
</pallas_src>

<mosaic_0001>
module attributes {stable_mosaic.version = 11 : i64} {
  func.func @mlp_kernel(%arg0: i32, %arg1: memref<16x13xbf16, #tpu.memory_space<vmem>>, %arg2: memref<13x64xbf16, #tpu.memory_space<vmem>>, %arg3: memref<1x64xf32, #tpu.memory_space<vmem>>, %arg4: memref<64x32xbf16, #tpu.memory_space<vmem>>, %arg5: memref<1x32xf32, #tpu.memory_space<vmem>>, %arg6: memref<32x128xbf16, #tpu.memory_space<vmem>>, %arg7: memref<1x128xf32, #tpu.memory_space<vmem>>, %arg8: memref<16x128xf32, #tpu.memory_space<vmem>>) attributes {dimension_semantics = [#tpu.dimension_semantics<parallel>], iteration_bounds = array<i64: 1>, scalar_prefetch = 0 : i64, scratch_operands = 0 : i64, tpu.core_type = #tpu.core_type<tc>, window_params = [{transform_indices = @transform_0, window_bounds = array<i64: 16, 13>}, {pipeline_mode = #tpu.pipeline_mode<synchronous>, transform_indices = @transform_1, window_bounds = array<i64: 13, 64>}, {pipeline_mode = #tpu.pipeline_mode<synchronous>, transform_indices = @transform_2, window_bounds = array<i64: 1, 64>}, {pipeline_mode = #tpu.pipeline_mode<synchronous>, transform_indices = @transform_3, window_bounds = array<i64: 64, 32>}, {pipeline_mode = #tpu.pipeline_mode<synchronous>, transform_indices = @transform_4, window_bounds = array<i64: 1, 32>}, {pipeline_mode = #tpu.pipeline_mode<synchronous>, transform_indices = @transform_5, window_bounds = array<i64: 32, 128>}, {pipeline_mode = #tpu.pipeline_mode<synchronous>, transform_indices = @transform_6, window_bounds = array<i64: 1, 128>}, {transform_indices = @transform_7, window_bounds = array<i64: 16, 128>}]} {
    %c0 = arith.constant 0 : index
    %c0_0 = arith.constant 0 : index
    %0 = vector.load %arg1[%c0, %c0_0] : memref<16x13xbf16, #tpu.memory_space<vmem>>, vector<16x13xbf16>
    %c0_1 = arith.constant 0 : index
    %c0_2 = arith.constant 0 : index
    %1 = vector.load %arg2[%c0_1, %c0_2] : memref<13x64xbf16, #tpu.memory_space<vmem>>, vector<13x64xbf16>
    %cst = arith.constant dense<0.000000e+00> : vector<16x64xf32>
    %2 = tpu.matmul %0, %1, %cst {dimension_numbers = #tpu.dot_dimension_numbers<[1], [0], [0], [1], [0, 0, 1, 1], [], []>} : vector<16x13xbf16>, vector<13x64xbf16>, vector<16x64xf32> -> vector<16x64xf32>
    %c0_3 = arith.constant 0 : index
    %c0_4 = arith.constant 0 : index
    %3 = vector.load %arg3[%c0_3, %c0_4] : memref<1x64xf32, #tpu.memory_space<vmem>>, vector<1x64xf32>
    %4 = vector.broadcast %3 : vector<1x64xf32> to vector<16x64xf32>
    %5 = arith.addf %2, %4 : vector<16x64xf32>
    %cst_5 = arith.constant 0.000000e+00 : f32
    %6 = vector.broadcast %cst_5 : f32 to vector<16x64xf32>
    %7 = arith.maximumf %5, %6 : vector<16x64xf32>
    %8 = arith.truncf %7 : vector<16x64xf32> to vector<16x64xbf16>
    %c0_6 = arith.constant 0 : index
    %c0_7 = arith.constant 0 : index
    %9 = vector.load %arg4[%c0_6, %c0_7] : memref<64x32xbf16, #tpu.memory_space<vmem>>, vector<64x32xbf16>
    %cst_8 = arith.constant dense<0.000000e+00> : vector<16x32xf32>
    %10 = tpu.matmul %8, %9, %cst_8 {dimension_numbers = #tpu.dot_dimension_numbers<[1], [0], [0], [1], [0, 0, 1, 1], [], []>} : vector<16x64xbf16>, vector<64x32xbf16>, vector<16x32xf32> -> vector<16x32xf32>
    %c0_9 = arith.constant 0 : index
    %c0_10 = arith.constant 0 : index
    %11 = vector.load %arg5[%c0_9, %c0_10] : memref<1x32xf32, #tpu.memory_space<vmem>>, vector<1x32xf32>
    %12 = vector.broadcast %11 : vector<1x32xf32> to vector<16x32xf32>
    %13 = arith.addf %10, %12 : vector<16x32xf32>
    %cst_11 = arith.constant 0.000000e+00 : f32
    %14 = vector.broadcast %cst_11 : f32 to vector<16x32xf32>
    %15 = arith.maximumf %13, %14 : vector<16x32xf32>
    %16 = arith.truncf %15 : vector<16x32xf32> to vector<16x32xbf16>
    %c0_12 = arith.constant 0 : index
    %c0_13 = arith.constant 0 : index
    %17 = vector.load %arg6[%c0_12, %c0_13] : memref<32x128xbf16, #tpu.memory_space<vmem>>, vector<32x128xbf16>
    %cst_14 = arith.constant dense<0.000000e+00> : vector<16x128xf32>
    %18 = tpu.matmul %16, %17, %cst_14 {dimension_numbers = #tpu.dot_dimension_numbers<[1], [0], [0], [1], [0, 0, 1, 1], [], []>} : vector<16x32xbf16>, vector<32x128xbf16>, vector<16x128xf32> -> vector<16x128xf32>
    %c0_15 = arith.constant 0 : index
    %c0_16 = arith.constant 0 : index
    %19 = vector.load %arg7[%c0_15, %c0_16] : memref<1x128xf32, #tpu.memory_space<vmem>>, vector<1x128xf32>
    %20 = vector.broadcast %19 : vector<1x128xf32> to vector<16x128xf32>
    %21 = arith.addf %18, %20 : vector<16x128xf32>
    %c0_17 = arith.constant 0 : index
    %c0_18 = arith.constant 0 : index
    %22 = vector.load %arg8[%c0_17, %c0_18] : memref<16x128xf32, #tpu.memory_space<vmem>>, vector<16x128xf32>
    tpu.vector_store %arg8[%c0_17, %c0_18], %21 {strides = array<i32>} : memref<16x128xf32, #tpu.memory_space<vmem>>, vector<16x128xf32>,
    return
  }
  func.func @transform_0(%arg0: i32) -> (i32, i32) {
    %c0_i32 = arith.constant 0 : i32
    %c0_i32_0 = arith.constant 0 : i32
    return %arg0, %c0_i32 : i32, i32
  }
  func.func @transform_1(%arg0: i32) -> (i32, i32) {
    %c0_i32 = arith.constant 0 : i32
    %c0_i32_0 = arith.constant 0 : i32
    %c0_i32_1 = arith.constant 0 : i32
    return %c0_i32, %c0_i32_0 : i32, i32
  }
  func.func @transform_2(%arg0: i32) -> (i32, i32) {
    %c0_i32 = arith.constant 0 : i32
    %c0_i32_0 = arith.constant 0 : i32
    %c0_i32_1 = arith.constant 0 : i32
    return %c0_i32, %c0_i32_0 : i32, i32
  }
  func.func @transform_3(%arg0: i32) -> (i32, i32) {
    %c0_i32 = arith.constant 0 : i32
    %c0_i32_0 = arith.constant 0 : i32
    %c0_i32_1 = arith.constant 0 : i32
    return %c0_i32, %c0_i32_0 : i32, i32
  }
  func.func @transform_4(%arg0: i32) -> (i32, i32) {
    %c0_i32 = arith.constant 0 : i32
    %c0_i32_0 = arith.constant 0 : i32
    %c0_i32_1 = arith.constant 0 : i32
    return %c0_i32, %c0_i32_0 : i32, i32
  }
  func.func @transform_5(%arg0: i32) -> (i32, i32) {
    %c0_i32 = arith.constant 0 : i32
    %c0_i32_0 = arith.constant 0 : i32
    %c0_i32_1 = arith.constant 0 : i32
    return %c0_i32, %c0_i32_0 : i32, i32
  }
  func.func @transform_6(%arg0: i32) -> (i32, i32) {
    %c0_i32 = arith.constant 0 : i32
    %c0_i32_0 = arith.constant 0 : i32
    %c0_i32_1 = arith.constant 0 : i32
    return %c0_i32, %c0_i32_0 : i32, i32
  }
  func.func @transform_7(%arg0: i32) -> (i32, i32) {
    %c0_i32 = arith.constant 0 : i32
    %c0_i32_0 = arith.constant 0 : i32
    return %arg0, %c0_i32 : i32, i32
  }
}

</mosaic_0001>

<bundles_post_ra>
// kernel: tpu_custom_call.1
= control target key start
LH: loop header
LB: loop body
LE: loop exit
PB: predicated region body
PF: predicated region fallthrough
CT: control target
= control target key end

     0   :  { %vm50_vm0 = vcmask 1045504   ;;  %vm51_vm1 = vcmask 1046528   ;;  %v265_v3 = vmov 65535   ;;  %s348_s0 = inlined_call_operand.vmem [shape: bf16[16,13], index: 0, kind: input, shape index: {}]   ;;  %s349_s1 = inlined_call_operand.vmem [shape: bf16[13,64], index: 1, kind: input, shape index: {}]   ;;  %s350_s2 = inlined_call_operand.vmem [shape: f32[1,64], index: 2, kind: input, shape index: {}]   ;;  %s351_s3 = inlined_call_operand.vmem [shape: bf16[64,32], index: 3, kind: input, shape index: {}]   ;;  %s352_s4 = inlined_call_operand.vmem [shape: f32[1,32], index: 4, kind: input, shape index: {}]   ;;  %s353_s5 = inlined_call_operand.vmem [shape: bf16[32,128], index: 5, kind: input, shape index: {}]   ;;  %s354_s6 = inlined_call_operand.vmem [shape: f32[1,128], index: 6, kind: input, shape index: {}]   ;;  %s355_s7 = inlined_call_operand.hbm [shape: f32[16,128], index: 7, kind: output, shape index: {}]  }
   0x1   :  { %v195_v0 = vld [vmem:[%s349_s1] sm:$0xf]  ;;  %v225_v1 = vld [vmem:[%s349_s1] sm:$0x70]  ;;  %v52_v4 = vsel %vm50_vm0, 4294967295, %v265_v3 }
   0x2   :  { %v196_v2 = vor.u32 %v225_v1, %v195_v0  ;;  %v53_v5 = vsel %vm51_vm1, %v52_v4, 0 }
   0x3   :  { %12 = vsyncpa [#allocation3], 0  ;;  %v224_v7 = vld [vmem:[%s348_s0] sm:$0xff]  ;;  %vm46_vm2 = vcmask 105472   ;;  %v229_v8 = vld [vmem:[%s351_s3 + $0x18] sm:$0xff]  ;;  %vm110_vm3 = vcmask 523264  }
   0x4   :  { %v55_v6 = vand.u32 %v196_v2, %v53_v5  ;;  %118 = vmatpush.bf16.msra.mxu1 %v229_v8  ;;  %v228_v9 = vld [vmem:[%s351_s3 + $0x10] sm:$0xff]  ;;  %v227_v10 = vld [vmem:[%s351_s3 + $0x8] sm:$0xff]  ;;  %v226_v11 = vld [vmem:[%s351_s3] sm:$0xff]  ;;  %vm151_vm4 = vcmask 261120   ;;  %s267_s24 = smov 128   ;;  %s268_s25 = smov 8  }
   0x5   :  { %v236_v13 = vld [vmem:[%s350_s2] ss:$0 sm:$0xff]  ;;  %v231_v20 = vld [vmem:[%s353_s5 + $0x8] sm:$0xff] }
   0x6   :  { %64 = vmatpush.bf16.msra.mxu0 %v55_v6  ;;  %161 = vmatpush.bf16.msra.mxu2 %v231_v20  ;;  %v230_v21 = vld [vmem:[%s353_s5] sm:$0xff]  ;;  %s266_s5 = smov [#allocation2]  }
   0x7   :  { %v237_v23 = vld [vmem:[%s352_s4] ss:$0 sm:$0xff]  ;;  %s175_s21 = sshll.u32 %s266_s5, 4  ;;  %s177_s4 = sshll.u32 %s355_s7, 4  ;;  %s176_s21 = int_to_ptr.vmem [resolvable:$true] %s175_s21  ;;  %s178_s4 = int_to_ptr.hbm [resolvable:$true] %s177_s4 }
   0x8   :  { %119 = vmatpush.bf16.msra.mxu1 %v228_v9  ;;  %v238_v30 = vld [vmem:[%s354_s6] ss:$0 sm:$0xff] }
   0x9   :  { %197 = vmatmul.msk.bf16.vlgmr.msra.gmra.mxu0 %vm46_vm2, %v224_v7 }
   0xa   :  { %162 = vmatpush.bf16.msra.mxu2 %v230_v21 }
   0xc   :  { %120 = vmatpush.bf16.msra.mxu1 %v227_v10 }
  0x10   :  { %121 = vmatpush.bf16.msra.mxu1 %v226_v11 }
  0x86   :  { %v66_v12 = vpop.f32.mrf.mxu0 }
  0x87   :  { %v67_v14 = vadd.f32 %v236_v13, %v66_v12 }
  0x89   :  { %v71_v17 = vmax.f32 %v67_v14, 0.0 }
  0x8e   :  { %v68_v15 = vpop.f32.mrf.mxu0 }
  0x8f   :  { %v69_v16 = vadd.f32 %v236_v13, %v68_v15 }
  0x91   :  { %v72_v18 = vmax.f32 %v69_v16, 0.0 }
  0x93   :  { %v73_v19 = vpack.c.bf16 %v72_v18, %v71_v17 }
  0x95   :  { %214 = vmatmul.msk.bf16.vlgmr.msra.gmra.mxu1 %vm110_vm3, %v73_v19 }
 0x112   :  { %v123_v22 = vpop.f32.mrf.mxu1 }
 0x113   :  { %v124_v24 = vadd.f32 %v237_v23, %v123_v22 }
 0x115   :  { %v128_v27 = vmax.f32 %v124_v24, 0.0 }
 0x11a   :  { %v125_v25 = vpop.f32.mrf.mxu1 }
 0x11b   :  { %v126_v26 = vadd.f32 %v237_v23, %v125_v25 }
 0x11d   :  { %v129_v28 = vmax.f32 %v126_v26, 0.0 }
 0x11f   :  { %v130_v29 = vpack.c.bf16 %v129_v28, %v128_v27 }
 0x121   :  { %223 = vmatmul.msk.bf16.vlgmr.msra.gmra.mxu2 %vm151_vm4, %v130_v29 }
 0x1a4   :  { %v164_v31 = vpop.f32.mrf.mxu2 }
 0x1a5   :  { %v165_v32 = vadd.f32 %v238_v30, %v164_v31 }
 0x1a7   :  { %169 = vst [vmem:[#allocation2] sm:$0xff] %v165_v32 }
 0x1ac   :  { %v166_v33 = vpop.f32.mrf.mxu2 }
 0x1ad   :  { %v167_v34 = vadd.f32 %v238_v30, %v166_v33 }
 0x1af   :  { %170 = vst [vmem:[#allocation2 + $0x8] sm:$0xff] %v167_v34 }
 0x1b0   :  { %183 = dma.vmem_to_hbm [thread:$0]  %s176_s21, 256, %s178_s4, [#allocation3], %s267_s24, %s267_s24, %s268_s25  }
 0x1b1   :  { %263 = dma.done.wait [#allocation3], 256  }
 0x1b2   :  { %264 = vsyncadd [#allocation3], 4294967040 }
 0x1b3   :  { %188 = vsyncpa [#allocation3], 1 }

</bundles_post_ra>
